<compile_context>
chip_gen: v7x
topology: tpu7x:2x2x1
jax: 0.10.0
libtpu: 0.0.40
codegen_flags: <defaults>
</compile_context>

<pallas_src>
import functools

import jax
import jax.numpy as jnp
import numpy as np
from jax.experimental import pallas as pl
from jax.experimental.pallas import tpu as pltpu

BN_EPS = 1e-5


def _bn_relu(h, gamma, beta, mask, count):
    """Training-mode BatchNorm (batch mean, biased batch var) + ReLU.

    h: (C, M) f32; per-channel stats reduce over the lane axis (axis=1).
    `mask` (1, M) restricts the statistics to valid columns (None = all valid).
    Two-pass variance (centered sum of squares) for numerical robustness.
    Finishes with one fused scale*h + shift sweep (rsqrt goes to the EUP slot).
    """
    # TODO(synk): the two lane reduces could be moved onto the (~96% idle) MXU
    #             as dot([h; h*h], ones); not needed at this size.
    inv = 1.0 / count
    hm = h if mask is None else h * mask
    mean = jnp.sum(hm, axis=1, keepdims=True) * inv
    d = h - mean
    if mask is not None:
        d = d * mask
    var = jnp.sum(d * d, axis=1, keepdims=True) * inv
    scale = gamma * jax.lax.rsqrt(var + BN_EPS)
    shift = beta - mean * scale
    return jnp.maximum(h * scale + shift, 0.0)


def _encoder_block_kernel(cols1_ref, w1_ref, g1_ref, be1_ref,
                          w2_ref, g2_ref, be2_ref, mask_ref, o_ref,
                          *, co, wo1, m1, m2):
    # ---- Conv1: one MXU matmul, channel-major output (Co, M1). ----
    h1 = jnp.dot(w1_ref[...], cols1_ref[...],
                 preferred_element_type=jnp.float32)               # (Co, M1) f32

    # ---- BN1 (every M1 = N*Ho1*Wo1 column is a valid conv1 output) + ReLU ----
    h1 = _bn_relu(h1, g1_ref[...], be1_ref[...], None, m1)

    # ---- Conv2 im2col on the flat lane axis: the 9 taps are lane shifts of h1
    #      by dy*Wo1 + dx.  Conv2 is evaluated over the full M1 grid; columns
    #      whose (oy, ox) fall outside the valid window hold garbage that is
    #      masked out of the BN2 stats and never read by the extracted pool
    #      positions.  Taps stay f32 (8-row pieces = aligned sublane concat);
    #      one cast to bf16 feeds the MXU with f32 accumulation. ----
    h1p = jnp.concatenate(
        [h1, jnp.zeros((co, 2 * wo1 + 2), jnp.float32)], axis=1)   # (Co, M1+2*Wo1+2)
    taps = [h1p[:, dy * wo1 + dx: dy * wo1 + dx + m1]
            for dy in range(3) for dx in range(3)]                 # 9 x (Co, M1)
    cols2 = jnp.concatenate(taps, axis=0).astype(jnp.bfloat16)     # (9*Co, M1)
    h2 = jnp.dot(w2_ref[...], cols2,
                 preferred_element_type=jnp.float32)               # (Co, M1) f32

    # ---- BN2 (stats over the M2 valid columns only) + ReLU ----
    h2 = _bn_relu(h2, g2_ref[...], be2_ref[...], mask_ref[...], m2)

    # ---- MaxPool2d(2, 2): max of 4 lane-shifted copies (offsets
    #      {0, 1, Wo1, Wo1+1}); every window of an extracted (n, 2i, 2j)
    #      top-left reads only valid columns.  The dense (Co, M1) slab is
    #      stored directly; the wrapper subsamples it (output is tiny). ----
    h2p = jnp.concatenate(
        [h2, jnp.zeros((co, wo1 + 1), jnp.float32)], axis=1)       # (Co, M1+Wo1+1)
    pooled = jnp.maximum(
        jnp.maximum(h2p[:, 0:m1], h2p[:, 1:m1 + 1]),
        jnp.maximum(h2p[:, wo1:wo1 + m1], h2p[:, wo1 + 1:wo1 + 1 + m1]))
    o_ref[...] = pooled


def _im2col_nchw(x, ho, wo):
    """x: (N, C, H, W) -> (9*C, N*ho*wo), K-order (ky, kx, c), M-order
    (n, oy, ox).  Runs in XLA outside the kernel (hoisted layout work)."""
    n, c, _, _ = x.shape
    taps = jnp.stack([x[:, :, dy:dy + ho, dx:dx + wo]
                      for dy in range(3) for dx in range(3)], axis=0)
    return jnp.transpose(taps, (0, 2, 1, 3, 4)).reshape(9 * c, n * ho * wo)


def encoder_block(x_nchw, params):
    """x_nchw: (N, Cin, H, W) f32 (PyTorch layout).
    Returns (N, Cout, (H-4)//2, (W-4)//2) f32 (PyTorch layout)."""
    w1, b1, g1, be1, w2, b2, g2, be2 = params
    del b1, b2   # conv bias is exactly cancelled by training-mode BatchNorm
    n, ci, h, w = x_nchw.shape
    co = w1.shape[0]
    ho1, wo1 = h - 2, w - 2
    ho2, wo2 = ho1 - 2, wo1 - 2
    hp, wp = ho2 // 2, wo2 // 2
    m1, m2 = n * ho1 * wo1, n * ho2 * wo2

    # Conv1 im2col hoisted to XLA; MXU operands cast to bf16 up front
    # (f32 accumulation).  Per the review, f32 operands would be nearly as
    # fast at these shapes and numerically tighter -- bf16 is kept as an
    # explicit, contained trade (tolerance 3e-2).
    cols1 = _im2col_nchw(x_nchw.astype(jnp.bfloat16), ho1, wo1)       # (9*Ci, M1)
    w1k = jnp.transpose(w1, (0, 2, 3, 1)).reshape(co, 9 * ci).astype(jnp.bfloat16)
    w2k = jnp.transpose(w2, (0, 2, 3, 1)).reshape(co, 9 * co).astype(jnp.bfloat16)

    # Validity mask for the conv2-over-the-full-M1-grid trick.
    oy = (np.arange(m1) // wo1) % ho1
    ox = np.arange(m1) % wo1
    mask = jnp.asarray(((oy < ho2) & (ox < wo2))
                       .astype(np.float32).reshape(1, m1))

    g1c, be1c = g1.reshape(co, 1), be1.reshape(co, 1)
    g2c, be2c = g2.reshape(co, 1), be2.reshape(co, 1)

    kernel = functools.partial(_encoder_block_kernel,
                               co=co, wo1=wo1, m1=m1, m2=m2)
    vmem = pl.BlockSpec(memory_space=pltpu.MemorySpace.VMEM)
    pooled_flat = pl.pallas_call(
        kernel,
        out_shape=jax.ShapeDtypeStruct((co, m1), jnp.float32),
        in_specs=[vmem] * 8,
        out_specs=vmem,
    )(cols1, w1k, g1c, be1c, w2k, g2c, be2c, mask)

    # Tiny wrapper-side layout plumbing: pick the (n, 2i, 2j) top-left columns
    # of the pooled slab and return NCHW.
    pooled = pooled_flat.reshape(co, n, ho1, wo1)[:, :, 0:2 * hp:2, 0:2 * wp:2]
    return jnp.transpose(pooled, (1, 0, 2, 3))


def _ref_forward(x_nchw, params):
    """Pure-JAX NCHW reference (keeps the conv biases; training-mode BN cancels
    them, so it must match the bias-free kernel up to rounding)."""
    w1, b1, g1, be1, w2, b2, g2, be2 = params

    def conv(x, w, b):
        y = jax.lax.conv_general_dilated(
            x, w, window_strides=(1, 1), padding='VALID',
            dimension_numbers=('NCHW', 'OIHW', 'NCHW'),
            precision=jax.lax.Precision.HIGHEST)
        return y + b.reshape(1, -1, 1, 1)

    def bn_relu(y, g, be):
        mean = y.mean(axis=(0, 2, 3), keepdims=True)
        var = ((y - mean) ** 2).mean(axis=(0, 2, 3), keepdims=True)
        y = (y - mean) / jnp.sqrt(var + BN_EPS)
        return jnp.maximum(y * g.reshape(1, -1, 1, 1) + be.reshape(1, -1, 1, 1),
                           0.0)

    y = bn_relu(conv(x_nchw, w1, b1), g1, be1)
    y = bn_relu(conv(y, w2, b2), g2, be2)
    nn_, c, hh, ww = y.shape
    y = y[:, :, :hh // 2 * 2, :ww // 2 * 2].reshape(
        nn_, c, hh // 2, 2, ww // 2, 2)
    return y.max(axis=(3, 5))


if __name__ == "__main__":
    # Small shapes consistent with the module: N=2, Cin=4, H=W=16, Cout=8.
    N, Cin, H, W, Cout = 2, 4, 16, 16, 8

    key = jax.random.PRNGKey(0)
    kx, kw1, kb1, kw2, kb2 = jax.random.split(key, 5)

    x = jax.random.normal(kx, (N, Cin, H, W), jnp.float32)     # NCHW (PyTorch)

    # OIHW conv weights; BN gamma=1, beta=0 (nn.BatchNorm2d defaults).
    w1 = 0.1 * jax.random.normal(kw1, (Cout, Cin, 3, 3), jnp.float32)
    b1 = 0.1 * jax.random.normal(kb1, (Cout,), jnp.float32)
    g1 = jnp.ones((Cout,), jnp.float32)
    be1 = jnp.zeros((Cout,), jnp.float32)
    w2 = 0.1 * jax.random.normal(kw2, (Cout, Cout, 3, 3), jnp.float32)
    b2 = 0.1 * jax.random.normal(kb2, (Cout,), jnp.float32)
    g2 = jnp.ones((Cout,), jnp.float32)
    be2 = jnp.zeros((Cout,), jnp.float32)

    params = (w1, b1, g1, be1, w2, b2, g2, be2)

    out = jax.block_until_ready(encoder_block(x, params))
    ref = jax.block_until_ready(_ref_forward(x, params))

    assert out.shape == (N, Cout, (H - 4) // 2, (W - 4) // 2), out.shape
    # bf16 MXU operands (f32 accumulation) -> loose-ish tolerance.
    np.testing.assert_allclose(np.asarray(out), np.asarray(ref),
                               rtol=3e-2, atol=3e-2)

    print("KERNEL_OK")
</pallas_src>

<mosaic_0001>
module attributes {stable_mosaic.version = 11 : i64} {
  func.func @_encoder_block_kernel(%arg0: memref<36x392xbf16, #tpu.memory_space<vmem>>, %arg1: memref<8x36xbf16, #tpu.memory_space<vmem>>, %arg2: memref<8x1xf32, #tpu.memory_space<vmem>>, %arg3: memref<8x1xf32, #tpu.memory_space<vmem>>, %arg4: memref<8x72xbf16, #tpu.memory_space<vmem>>, %arg5: memref<8x1xf32, #tpu.memory_space<vmem>>, %arg6: memref<8x1xf32, #tpu.memory_space<vmem>>, %arg7: memref<1x392xf32, #tpu.memory_space<vmem>>, %arg8: memref<8x392xf32, #tpu.memory_space<vmem>>) attributes {dimension_semantics = [], scalar_prefetch = 0 : i64, scratch_operands = 0 : i64, tpu.core_type = #tpu.core_type<tc>} {
    %c0 = arith.constant 0 : index
    %c0_0 = arith.constant 0 : index
    %0 = vector.load %arg1[%c0, %c0_0] : memref<8x36xbf16, #tpu.memory_space<vmem>>, vector<8x36xbf16>
    %c0_1 = arith.constant 0 : index
    %c0_2 = arith.constant 0 : index
    %1 = vector.load %arg0[%c0_1, %c0_2] : memref<36x392xbf16, #tpu.memory_space<vmem>>, vector<36x392xbf16>
    %cst = arith.constant dense<0.000000e+00> : vector<8x392xf32>
    %2 = tpu.matmul %0, %1, %cst {dimension_numbers = #tpu.dot_dimension_numbers<[1], [0], [0], [1], [0, 0, 1, 1], [], []>} : vector<8x36xbf16>, vector<36x392xbf16>, vector<8x392xf32> -> vector<8x392xf32>
    %c0_3 = arith.constant 0 : index
    %c0_4 = arith.constant 0 : index
    %3 = vector.load %arg2[%c0_3, %c0_4] : memref<8x1xf32, #tpu.memory_space<vmem>>, vector<8x1xf32>
    %c0_5 = arith.constant 0 : index
    %c0_6 = arith.constant 0 : index
    %4 = vector.load %arg3[%c0_5, %c0_6] : memref<8x1xf32, #tpu.memory_space<vmem>>, vector<8x1xf32>
    %cst_7 = arith.constant dense<0.000000e+00> : vector<8xf32>
    %5 = vector.multi_reduction <add>, %2, %cst_7 [1] : vector<8x392xf32> to vector<8xf32>
    %6 = vector.shape_cast %5 : vector<8xf32> to vector<8x1xf32>
    %cst_8 = arith.constant 0.00255102036 : f32
    %7 = vector.broadcast %cst_8 : f32 to vector<8x1xf32>
    %8 = arith.mulf %6, %7 : vector<8x1xf32>
    %9 = vector.broadcast %8 : vector<8x1xf32> to vector<8x392xf32>
    %10 = arith.subf %2, %9 : vector<8x392xf32>
    %11 = arith.mulf %10, %10 : vector<8x392xf32>
    %cst_9 = arith.constant dense<0.000000e+00> : vector<8xf32>
    %12 = vector.multi_reduction <add>, %11, %cst_9 [1] : vector<8x392xf32> to vector<8xf32>
    %13 = vector.shape_cast %12 : vector<8xf32> to vector<8x1xf32>
    %cst_10 = arith.constant 0.00255102036 : f32
    %14 = vector.broadcast %cst_10 : f32 to vector<8x1xf32>
    %15 = arith.mulf %13, %14 : vector<8x1xf32>
    %cst_11 = arith.constant 9.99999974E-6 : f32
    %16 = vector.broadcast %cst_11 : f32 to vector<8x1xf32>
    %17 = arith.addf %15, %16 : vector<8x1xf32>
    %18 = math.rsqrt %17 : vector<8x1xf32>
    %19 = arith.mulf %3, %18 : vector<8x1xf32>
    %20 = arith.mulf %8, %19 : vector<8x1xf32>
    %21 = arith.subf %4, %20 : vector<8x1xf32>
    %22 = vector.broadcast %19 : vector<8x1xf32> to vector<8x392xf32>
    %23 = arith.mulf %2, %22 : vector<8x392xf32>
    %24 = vector.broadcast %21 : vector<8x1xf32> to vector<8x392xf32>
    %25 = arith.addf %23, %24 : vector<8x392xf32>
    %cst_12 = arith.constant 0.000000e+00 : f32
    %26 = vector.broadcast %cst_12 : f32 to vector<8x392xf32>
    %27 = arith.maximumf %25, %26 : vector<8x392xf32>
    %cst_13 = arith.constant 0.000000e+00 : f32
    %28 = vector.broadcast %cst_13 : f32 to vector<8x30xf32>
    %29 = tpu.concatenate %27, %28 in 1 : vector<8x392xf32>, vector<8x30xf32> -> vector<8x422xf32>
    %30 = vector.extract_strided_slice %29 {offsets = [0, 0], sizes = [8, 392], strides = [1, 1]} : vector<8x422xf32> to vector<8x392xf32>
    %31 = vector.extract_strided_slice %29 {offsets = [0, 1], sizes = [8, 392], strides = [1, 1]} : vector<8x422xf32> to vector<8x392xf32>
    %32 = vector.extract_strided_slice %29 {offsets = [0, 2], sizes = [8, 392], strides = [1, 1]} : vector<8x422xf32> to vector<8x392xf32>
    %33 = vector.extract_strided_slice %29 {offsets = [0, 14], sizes = [8, 392], strides = [1, 1]} : vector<8x422xf32> to vector<8x392xf32>
    %34 = vector.extract_strided_slice %29 {offsets = [0, 15], sizes = [8, 392], strides = [1, 1]} : vector<8x422xf32> to vector<8x392xf32>
    %35 = vector.extract_strided_slice %29 {offsets = [0, 16], sizes = [8, 392], strides = [1, 1]} : vector<8x422xf32> to vector<8x392xf32>
    %36 = vector.extract_strided_slice %29 {offsets = [0, 28], sizes = [8, 392], strides = [1, 1]} : vector<8x422xf32> to vector<8x392xf32>
    %37 = vector.extract_strided_slice %29 {offsets = [0, 29], sizes = [8, 392], strides = [1, 1]} : vector<8x422xf32> to vector<8x392xf32>
    %38 = vector.extract_strided_slice %29 {offsets = [0, 30], sizes = [8, 392], strides = [1, 1]} : vector<8x422xf32> to vector<8x392xf32>
    %39 = tpu.concatenate %30, %31, %32, %33, %34, %35, %36, %37, %38 in 0 : vector<8x392xf32>, vector<8x392xf32>, vector<8x392xf32>, vector<8x392xf32>, vector<8x392xf32>, vector<8x392xf32>, vector<8x392xf32>, vector<8x392xf32>, vector<8x392xf32> -> vector<72x392xf32>
    %40 = arith.truncf %39 : vector<72x392xf32> to vector<72x392xbf16>
    %c0_14 = arith.constant 0 : index
    %c0_15 = arith.constant 0 : index
    %41 = vector.load %arg4[%c0_14, %c0_15] : memref<8x72xbf16, #tpu.memory_space<vmem>>, vector<8x72xbf16>
    %cst_16 = arith.constant dense<0.000000e+00> : vector<8x392xf32>
    %42 = tpu.matmul %41, %40, %cst_16 {dimension_numbers = #tpu.dot_dimension_numbers<[1], [0], [0], [1], [0, 0, 1, 1], [], []>} : vector<8x72xbf16>, vector<72x392xbf16>, vector<8x392xf32> -> vector<8x392xf32>
    %c0_17 = arith.constant 0 : index
    %c0_18 = arith.constant 0 : index
    %43 = vector.load %arg5[%c0_17, %c0_18] : memref<8x1xf32, #tpu.memory_space<vmem>>, vector<8x1xf32>
    %c0_19 = arith.constant 0 : index
    %c0_20 = arith.constant 0 : index
    %44 = vector.load %arg6[%c0_19, %c0_20] : memref<8x1xf32, #tpu.memory_space<vmem>>, vector<8x1xf32>
    %c0_21 = arith.constant 0 : index
    %c0_22 = arith.constant 0 : index
    %45 = vector.load %arg7[%c0_21, %c0_22] : memref<1x392xf32, #tpu.memory_space<vmem>>, vector<1x392xf32>
    %46 = vector.broadcast %45 : vector<1x392xf32> to vector<8x392xf32>
    %47 = arith.mulf %42, %46 : vector<8x392xf32>
    %cst_23 = arith.constant dense<0.000000e+00> : vector<8xf32>
    %48 = vector.multi_reduction <add>, %47, %cst_23 [1] : vector<8x392xf32> to vector<8xf32>
    %49 = vector.shape_cast %48 : vector<8xf32> to vector<8x1xf32>
    %cst_24 = arith.constant 0.00347222225 : f32
    %50 = vector.broadcast %cst_24 : f32 to vector<8x1xf32>
    %51 = arith.mulf %49, %50 : vector<8x1xf32>
    %52 = vector.broadcast %51 : vector<8x1xf32> to vector<8x392xf32>
    %53 = arith.subf %42, %52 : vector<8x392xf32>
    %54 = vector.broadcast %45 : vector<1x392xf32> to vector<8x392xf32>
    %55 = arith.mulf %53, %54 : vector<8x392xf32>
    %56 = arith.mulf %55, %55 : vector<8x392xf32>
    %cst_25 = arith.constant dense<0.000000e+00> : vector<8xf32>
    %57 = vector.multi_reduction <add>, %56, %cst_25 [1] : vector<8x392xf32> to vector<8xf32>
    %58 = vector.shape_cast %57 : vector<8xf32> to vector<8x1xf32>
    %cst_26 = arith.constant 0.00347222225 : f32
    %59 = vector.broadcast %cst_26 : f32 to vector<8x1xf32>
    %60 = arith.mulf %58, %59 : vector<8x1xf32>
    %cst_27 = arith.constant 9.99999974E-6 : f32
    %61 = vector.broadcast %cst_27 : f32 to vector<8x1xf32>
    %62 = arith.addf %60, %61 : vector<8x1xf32>
    %63 = math.rsqrt %62 : vector<8x1xf32>
    %64 = arith.mulf %43, %63 : vector<8x1xf32>
    %65 = arith.mulf %51, %64 : vector<8x1xf32>
    %66 = arith.subf %44, %65 : vector<8x1xf32>
    %67 = vector.broadcast %64 : vector<8x1xf32> to vector<8x392xf32>
    %68 = arith.mulf %42, %67 : vector<8x392xf32>
    %69 = vector.broadcast %66 : vector<8x1xf32> to vector<8x392xf32>
    %70 = arith.addf %68, %69 : vector<8x392xf32>
    %cst_28 = arith.constant 0.000000e+00 : f32
    %71 = vector.broadcast %cst_28 : f32 to vector<8x392xf32>
    %72 = arith.maximumf %70, %71 : vector<8x392xf32>
    %cst_29 = arith.constant 0.000000e+00 : f32
    %73 = vector.broadcast %cst_29 : f32 to vector<8x15xf32>
    %74 = tpu.concatenate %72, %73 in 1 : vector<8x392xf32>, vector<8x15xf32> -> vector<8x407xf32>
    %75 = vector.extract_strided_slice %74 {offsets = [0, 0], sizes = [8, 392], strides = [1, 1]} : vector<8x407xf32> to vector<8x392xf32>
    %76 = vector.extract_strided_slice %74 {offsets = [0, 1], sizes = [8, 392], strides = [1, 1]} : vector<8x407xf32> to vector<8x392xf32>
    %77 = arith.maximumf %75, %76 : vector<8x392xf32>
    %78 = vector.extract_strided_slice %74 {offsets = [0, 14], sizes = [8, 392], strides = [1, 1]} : vector<8x407xf32> to vector<8x392xf32>
    %79 = vector.extract_strided_slice %74 {offsets = [0, 15], sizes = [8, 392], strides = [1, 1]} : vector<8x407xf32> to vector<8x392xf32>
    %80 = arith.maximumf %78, %79 : vector<8x392xf32>
    %81 = arith.maximumf %77, %80 : vector<8x392xf32>
    %c0_30 = arith.constant 0 : index
    %c0_31 = arith.constant 0 : index
    %82 = vector.load %arg8[%c0_30, %c0_31] : memref<8x392xf32, #tpu.memory_space<vmem>>, vector<8x392xf32>
    tpu.vector_store %arg8[%c0_30, %c0_31], %81 {strides = array<i32>} : memref<8x392xf32, #tpu.memory_space<vmem>>, vector<8x392xf32>,
    return
  }
}

</mosaic_0001>

<bundles_post_ra>
// kernel: tpu_custom_call.1
= control target key start
LH: loop header
LB: loop body
LE: loop exit
PB: predicated region body
PF: predicated region fallthrough
CT: control target
= control target key end

     0   :  { %13 = vsyncpa [#allocation3], 0  ;;  %s1016_s0 = inlined_call_operand.hbm [shape: bf16[36,392], index: 0, kind: input, shape index: {}]   ;;  %s1017_s1 = inlined_call_operand.vmem [shape: bf16[8,36], index: 1, kind: input, shape index: {}]   ;;  %s1018_s2 = inlined_call_operand.vmem [shape: f32[8,1], index: 2, kind: input, shape index: {}]   ;;  %s1019_s3 = inlined_call_operand.vmem [shape: f32[8,1], index: 3, kind: input, shape index: {}]   ;;  %s1020_s4 = inlined_call_operand.vmem [shape: bf16[8,72], index: 4, kind: input, shape index: {}]   ;;  %s1021_s5 = inlined_call_operand.vmem [shape: f32[8,1], index: 5, kind: input, shape index: {}]   ;;  %s1022_s6 = inlined_call_operand.vmem [shape: f32[8,1], index: 6, kind: input, shape index: {}]   ;;  %s1023_s7 = inlined_call_operand.vmem [shape: f32[1,392], index: 7, kind: input, shape index: {}]   ;;  %s1024_s8 = inlined_call_operand.hbm [shape: f32[8,392], index: 8, kind: output, shape index: {}]  }
   0x1   :  { %14 = vsyncpa [#allocation4], 0  ;;  %s839_s27 = smov [#allocation2]   ;;  %s791_s9 = scalar_lea.hbm %s1016_s0, 1280 }
   0x2   :  { %s20_s28 = sshll.u32 %s839_s27, 4  ;;  %p792_p0 = scmp.ne.s32.totalorder %s1016_s0, %s791_s9  ;;  %s21_s28 = int_to_ptr.vmem [resolvable:$true] %s20_s28 }
   0x3   :  { %p795_p1 = scmp.lt.u32.totalorder %s791_s9, %s1016_s0 }
   0x5   :  { %p797_p2 = pnand %p795_p1, %p792_p0 }
   0x7   :  { %800 = shalt.err (!%p797_p2)
}
   0x8   :  { %s801_s14 = scalar_lea.vmem %s21_s28, 1280  ;;  %p806_p4 = scmp.lt.s32.totalorder %s21_s28, %s21_s28 }
   0x9   :  { %p802_p3 = scmp.ne.s32.totalorder %s21_s28, %s801_s14  ;;  %p807_p5 = scmp.lt.s32.totalorder %s801_s14, %s801_s14 }
   0xb   :  { %p808_p6 = por %p807_p5, %p806_p4 }
   0xd   :  { %p809_p7 = pnand %p808_p6, %p802_p3 }
   0xf   :  { %812 = shalt.err (!%p809_p7)
}
  0x10   :  { %s840_s15 = smov 256   ;;  %s841_s16 = smov 16  }
  0x11   :  { %26 = dma.hbm_to_vmem [thread:$0]  %s1016_s0, 1280, %s21_s28, [#allocation3], %s840_s15, %s840_s15, %s841_s16  }
  0x12   :  { %835 = dma.done.wait [#allocation3], 1280  }
  0x13   :  { %836 = vsyncadd [#allocation3], 4294966016  ;;  %v842_v0 = vmov 0   ;;  %v771_v1 = vld [vmem:[#allocation2 + $0x4] ss:$16 sps:$4 sm:$0xff]   ;;  %vm110_vm0 = vcmask 1041408  }
  0x14   :  { %155 = vmatprep.mubr.bf16.mxu0 %v842_v0  ;;  %196 = vmatprep.mubr.bf16.mxu1 %v842_v0  ;;  %v773_v2 = vld [vmem:[#allocation2 + $0xc] ss:$16 sps:$4 sm:$0xff]   ;;  %v775_v3 = vld [vmem:[#allocation2] ss:$16 sps:$4 sm:$0xff]   ;;  %v776_v4 = vld [vmem:[#allocation2 + $0x8] ss:$16 sps:$4 sm:$0xff]  }
  0x15   :  { %694 = vset.pattern.permute.xlu1 %v842_v0  ;;  %770 = vset.pattern.permute.xlu0 %v842_v0  ;;  %v777_v5 = vld [vmem:[#allocation2 + $0x24] ss:$16 sps:$4 sm:$0xff]   ;;  %v779_v6 = vld [vmem:[#allocation2 + $0x2c] ss:$16 sps:$4 sm:$0xff]   ;;  %v781_v7 = vld [vmem:[#allocation2 + $0x20] ss:$16 sps:$4 sm:$0xff]  }
  0x16   :  { %123 = vmatprep.subr.bf16.mxu0 %v771_v1  ;;  %164 = vmatprep.subr.bf16.mxu1 %v773_v2  ;;  %v782_v8 = vld [vmem:[#allocation2 + $0x28] ss:$16 sps:$4 sm:$0xff]   ;;  %v54_v9 = vld [vmem:[#allocation2 + $0x40] sm:$0x33]  ;;  %vm106_vm1 = vcmask 293888   ;;  %vm209_vm2 = vcmask 64512  }
  0x17   :  { %124 = vmatpush1.bf16.msra.mxu0 %v775_v3  ;;  %165 = vmatpush1.bf16.msra.mxu1 %v776_v4  ;;  %v55_v10 = vld [vmem:[#allocation2 + $0x48] sm:$0x33]  ;;  %v666_v11 = vcombine.high %v54_v9, %v54_v9  ;;  %v665_v13 = vcombine.low %v54_v9, %v54_v9  ;;  %v45_v17 = vld [vmem:[%s1017_s1] sm:$0xf]  ;;  %s845_s23 = smov 114   ;;  %s846_s24 = smov 112  }
  0x18   :  { %125 = vmatprep.subr.bf16.mxu0 %v777_v5  ;;  %166 = vmatprep.subr.bf16.mxu1 %v779_v6  ;;  %v668_v12 = vcombine.high %v55_v10, %v55_v10  ;;  %v667_v14 = vcombine.low %v55_v10, %v55_v10  ;;  %v205_v47 = vld [vmem:[%s1018_s2] sm:$0xff]  ;;  %s843_s2 = smov 126   ;;  %s847_s25 = smov 113   ;;  %vm270_vm3 = vcmask 1039360   ;;  %vm302_vm4 = vcmask 932864  }
  0x19   :  { %v112_v15 = vsel %vm110_vm0, %v665_v13, 0  ;;  %v206_v50 = vld [vmem:[%s1019_s3] sm:$0xff]  ;;  %s844_s3 = smov 127   ;;  %s848_s26 = smov 99   ;;  %vm286_vm5 = vcmask 1031168   ;;  %vm851_vm6 = vmmov 1  }
  0x1a   :  { %v118_v16 = vsel %vm110_vm0, %v667_v14, 0  ;;  %s849_s27 = smov 100   ;;  %s850_s28 = smov 98   ;;  %vm675_vm7 = vmpackc.low %vm851_vm6, %vm209_vm2  ;;  %vm334_vm8 = vcmask 916480   ;;  %vm318_vm9 = vcmask 924672   ;;  %vm350_vm10 = vcmask 818176  }
  0x1b   :  { %126 = vmatpush1.bf16.msra.mxu0 %v781_v7  ;;  %167 = vmatpush1.bf16.msra.mxu1 %v782_v8  ;;  %vm366_vm11 = vcmask 809984   ;;  %vm382_vm12 = vcmask 801792   ;;  %vm415_vm13 = vcmask 1043456   ;;  %vm411_vm14 = vcmask 588800  }
  0x1c   :  { %669 = vmatprep.subr.msk.bf16.mxu0 %vm110_vm0, %v666_v11  ;;  %671 = vmatprep.subr.msk.bf16.mxu1 %vm110_vm0, %v668_v12 }
  0x1f   :  { %128 = vmatpush1.bf16.msra.mxu0 %v112_v15  ;;  %169 = vmatpush1.bf16.msra.mxu1 %v118_v16 }
  0x22   :  { %670 = vmatmul.mubr.msk.bf16.vlgmr.msra.gmra.mrb[0].mxu0 %vm106_vm1, %v45_v17  ;;  %672 = vmatmul.mubr.msk.bf16.vlgmr.msra.gmra.mrb[0].mxu1 %vm106_vm1, %v45_v17 }
  0x23   :  { %460 = vmatprep.mubr.bf16.mxu0 %v842_v0  ;;  %501 = vmatprep.mubr.bf16.mxu1 %v842_v0 }
  0xf5   :  { %v157_v18 = vpop.f32.mrb[0].mxu0  ;;  %v198_v19 = vpop.f32.mrb[0].mxu1 }
  0xf6   :  { %v159_v20 = vpop.f32.mrb[1].mxu0  ;;  %v200_v21 = vpop.f32.mrb[1].mxu1 }
  0xf7   :  { %v207_v22 = vadd.f32 %v159_v20, %v157_v18  ;;  %v161_v23 = vpop.f32.mrb[2].mxu0  ;;  %v202_v24 = vpop.f32.mrb[2].mxu1  ;;  %v210_v27 = vsel %vm209_vm2, %v200_v21, 0.0 }
  0xf8   :  { %v162_v25 = vpop.f32.mrb[3].mxu0  ;;  %v203_v26 = vpop.f32.mrb[3].mxu1 }
  0xf9   :  { %v208_v28 = vadd.f32 %v207_v22, %v198_v19 }
  0xfb   :  { %v211_v29 = vadd.f32 %v210_v27, %v208_v28 }
  0xfd   :  { %212 = vadd.xlane.f32.xlu0 %v211_v29 }
 0x18a   :  { %v213_v30 = vpop.xlane.xlu0 %212 }
 0x18b   :  { %v214_v31 = vmul.f32 0.0025510204, %v213_v30 }
 0x18d   :  { %v215_v32 = vsub.f32 %v157_v18, %v214_v31  ;;  %v216_v33 = vsub.f32 %v159_v20, %v214_v31  ;;  %v217_v34 = vsub.f32 %v198_v19, %v214_v31  ;;  %v218_v35 = vsub.f32 %v200_v21, %v214_v31 }
 0x18f   :  { %v219_v36 = vmul.f32 %v215_v32, %v215_v32  ;;  %v220_v37 = vmul.f32 %v216_v33, %v216_v33  ;;  %v222_v38 = vmul.f32 %v218_v35, %v218_v35  ;;  %v221_v39 = vmul.f32 %v217_v34, %v217_v34 }
 0x191   :  { %v223_v40 = vadd.f32 %v220_v37, %v219_v36  ;;  %v225_v42 = vsel %vm209_vm2, %v222_v38, 0.0 }
 0x193   :  { %v224_v41 = vadd.f32 %v223_v40, %v221_v39 }
 0x195   :  { %v226_v43 = vadd.f32 %v225_v42, %v224_v41 }
 0x197   :  { %227 = vadd.xlane.f32.xlu0 %v226_v43 }
 0x224   :  { %v228_v44 = vpop.xlane.xlu0 %227 }
 0x225   :  { %v229_v45 = vmul.f32 0.0025510204, %v228_v44 }
 0x227   :  { %v230_v46 = vadd.f32 1e-05, %v229_v45 }
 0x229   :  { %787 = vrsqrt.f32 %v230_v46 }
 0x233   :  { %v788_v48 = vpop.eup %787 }
 0x234   :  { %v232_v49 = vmul.f32 %v788_v48, %v205_v47 }
 0x236   :  { %237 = vperm.xlu1 %694, %v232_v49   ;;  %v233_v51 = vmul.f32 %v232_v49, %v214_v31 }
 0x238   :  { %v234_v52 = vsub.f32 %v206_v50, %v233_v51 }
 0x23a   :  { %246 = vperm.xlu1 %694, %v234_v52  }
 0x2b5   :  { %v238_v53 = vpop.permute.xlu1 %237 }
 0x2b6   :  { %v241_v54 = vmul.f32 %v238_v53, %v159_v20  ;;  %v242_v55 = vmul.f32 %v238_v53, %v198_v19  ;;  %v243_v61 = vmul.f32 %v238_v53, %v200_v21  ;;  %v240_v0 = vmul.f32 %v238_v53, %v157_v18 }
 0x2b9   :  { %v247_v56 = vpop.permute.xlu1 %246 }
 0x2ba   :  { %v250_v57 = vadd.f32 %v247_v56, %v241_v54  ;;  %v251_v58 = vadd.f32 %v247_v56, %v242_v55  ;;  %v252_v63 = vadd.f32 %v247_v56, %v243_v61  ;;  %v249_v1 = vadd.f32 %v247_v56, %v240_v0 }
 0x2bc   :  { %v254_v59 = vmax.f32 %v250_v57, 0.0  ;;  %v921_v60 = vmax.f32 %v251_v58, 0.0  ;;  %v256_v2 = vmax.f32 %v252_v63, 0.0  ;;  %v926_v3 = vmax.f32 %v249_v1, 0.0 }
 0x2be   :  { %v700_v62 = vpack.i.bf16 %v921_v60, %v254_v59  ;;  %v257_v4 = vsel %vm209_vm2, %v256_v2, 0.0  ;;  %v760_v6 = vpack.i.bf16 %v254_v59, %v926_v3 }
 0x2bf   :  { %v750_v5 = vpack.i.bf16 %v257_v4, %v926_v3 }
 0x2c0   :  { %701 = vrot.lane.b32.xlu1 %v700_v62, %s843_s2  ;;  %696 = vrot.lane.b32.xlu0 %v700_v62, %s844_s3 }
 0x2c4   :  { %706 = vrot.lane.b32.xlu1 %v700_v62, %s845_s23  ;;  %716 = vrot.lane.b32.xlu0 %v700_v62, %s846_s24 }
 0x2c8   :  { %711 = vrot.lane.b32.xlu1 %v700_v62, %s847_s25  ;;  %726 = vrot.lane.b32.xlu0 %v700_v62, %s848_s26 }
 0x2cc   :  { %721 = vrot.lane.b32.xlu1 %v700_v62, %s849_s27  ;;  %751 = vrot.lane.b32.xlu0 %v750_v5, %s846_s24 }
 0x2d0   :  { %766 = vrot.lane.b32.xlu0 %v750_v5, %s848_s26  ;;  %731 = vrot.lane.b32.xlu1 %v750_v5, %s844_s3 }
 0x2d4   :  { %378 = vrot.lane.b32.xlu0 %v921_v60, %s850_s28  ;;  %736 = vrot.lane.b32.xlu1 %v750_v5, %s843_s2 }
 0x2d8   :  { %741 = vrot.lane.b32.xlu1 %v750_v5, %s845_s23 }
 0x2dc   :  { %746 = vrot.lane.b32.xlu1 %v750_v5, %s847_s25 }
 0x2e0   :  { %756 = vrot.lane.b32.xlu1 %v750_v5, %s849_s27 }
 0x2e4   :  { %761 = vrot.lane.b32.xlu1 %v760_v6, %s850_s28 }
 0x2e8   :  { %380 = vrot.lane.b32.xlu1 %v257_v4, %s850_s28 }
 0x332   :  { %v702_v7 = vpop.permute.xlu1 %701  ;;  %v697_v8 = vpop.permute.xlu0 %696 }
 0x333   :  { %v699_v9 = vunpack.i.h.bf16 %v697_v8  ;;  %v698_v10 = vunpack.i.l.bf16 %v697_v8  ;;  %v704_v21 = vunpack.i.h.bf16 %v702_v7  ;;  %v703_v22 = vunpack.i.l.bf16 %v702_v7 }
 0x335   :  { %v272_v11 = vsel %vm270_vm3, %v698_v10, %v699_v9  ;;  %v288_v37 = vsel %vm286_vm5, %v703_v22, %v704_v21 }
 0x336   :  { %v707_v12 = vpop.permute.xlu1 %706  ;;  %v391_v13 = vpack.c.bf16 %v272_v11, %v254_v59  ;;  %v937_v15 = vpop.permute.xlu0 %716 }
 0x337   :  { %v709_v17 = vunpack.i.h.bf16 %v707_v12  ;;  %v708_v18 = vunpack.i.l.bf16 %v707_v12  ;;  %v719_v28 = vunpack.i.h.bf16 %v937_v15  ;;  %v718_v29 = vunpack.i.l.bf16 %v937_v15 }
 0x338   :  { %428 = vmatprep.subr.bf16.mxu0 %v391_v13 }
 0x339   :  { %v304_v27 = vsel %vm302_vm4, %v708_v18, %v709_v17  ;;  %v336_v42 = vsel %vm334_vm8, %v718_v29, %v719_v28 }
 0x33a   :  { %v935_v14 = vpop.permute.xlu1 %711  ;;  %v941_v19 = vpop.permute.xlu0 %726  ;;  %v395_v39 = vpack.c.bf16 %v304_v27, %v288_v37  ;;  %v514_v37 = vlaneseq }
 0x33b   :  { %v714_v33 = vunpack.i.h.bf16 %v935_v14  ;;  %v713_v34 = vunpack.i.l.bf16 %v935_v14  ;;  %v729_v56 = vunpack.i.h.bf16 %v941_v19  ;;  %v728_v57 = vunpack.i.l.bf16 %v941_v19 }
 0x33d   :  { %v320_v46 = vsel %vm318_vm9, %v713_v34, %v714_v33  ;;  %v368_v11 = vsel %vm366_vm11, %v728_v57, %v729_v56 }
 0x33e   :  { %v939_v16 = vpop.permute.xlu1 %721  ;;  %v752_v35 = vpop.permute.xlu0 %751  ;;  %v399_v63 = vpack.c.bf16 %v336_v42, %v320_v46 }
 0x33f   :  { %v724_v43 = vunpack.i.h.bf16 %v939_v16  ;;  %v723_v47 = vunpack.i.l.bf16 %v939_v16  ;;  %v754_v48 = vunpack.i.h.bf16 %v752_v35  ;;  %v753_v49 = vunpack.i.l.bf16 %v752_v35  ;;  %v410_v35 = vld [vmem:[%s1020_s4] sm:$0xf] }
 0x341   :  { %v337_v0 = vsel %vm334_vm8, %v719_v28, %v754_v48  ;;  %v335_v1 = vsel %vm334_vm8, %v753_v49, %v718_v29 }
 0x342   :  { %v732_v20 = vpop.permute.xlu1 %731  ;;  %v767_v51 = vpop.permute.xlu0 %766 }
 0x343   :  { %v734_v23 = vunpack.i.h.bf16 %v732_v20  ;;  %v733_v24 = vunpack.i.l.bf16 %v732_v20  ;;  %v768_v4 = vunpack.i.l.bf16 %v767_v51 }
 0x345   :  { %v273_v25 = vsel %vm270_vm3, %v699_v9, %v734_v23  ;;  %v676_v26 = vpack.c.bf16 %v734_v23, %v256_v2  ;;  %v271_v31 = vsel %vm270_vm3, %v733_v24, %v698_v10  ;;  %v769_v2 = vunpack.i.h.bf16 %v767_v51 }
 0x346   :  { %v392_v30 = vpack.c.bf16 %v273_v25, %v921_v60  ;;  %v737_v32 = vpop.permute.xlu1 %736  ;;  %v390_v36 = vpack.c.bf16 %v271_v31, %v926_v3  ;;  %v352_v3 = vsel %vm350_vm10, %v723_v47, %v724_v43  ;;  %v367_v16 = vsel %vm366_vm11, %v768_v4, %v728_v57  ;;  %v379_v25 = vpop.permute.xlu0 %378 }
 0x347   :  { %677 = vmatprep.subr.msk.bf16.mxu1 %vm675_vm7, %v676_v26  ;;  %v739_v38 = vunpack.i.h.bf16 %v737_v32  ;;  %v738_v40 = vunpack.i.l.bf16 %v737_v32  ;;  %v403_v14 = vpack.c.bf16 %v368_v11, %v352_v3  ;;  %v369_v15 = vsel %vm366_vm11, %v729_v56, %v769_v2 }
 0x348   :  { %470 = vmatpush1.bf16.msra.mxu1 %v392_v30  ;;  %429 = vmatpush1.bf16.msra.mxu0 %v390_v36 }
 0x349   :  { %430 = vmatprep.subr.bf16.mxu0 %v395_v39  ;;  %v289_v50 = vsel %vm286_vm5, %v704_v21, %v739_v38  ;;  %v287_v52 = vsel %vm286_vm5, %v738_v40, %v703_v22  ;;  %v512_v40 = vld [vmem:[%s1023_s7] sm:$0xf] }
 0x34a   :  { %v742_v41 = vpop.permute.xlu1 %741 }
 0x34b   :  { %v744_v44 = vunpack.i.h.bf16 %v742_v41  ;;  %v743_v45 = vunpack.i.l.bf16 %v742_v41 }
 0x34d   :  { %v305_v53 = vsel %vm302_vm4, %v709_v17, %v744_v44  ;;  %v303_v54 = vsel %vm302_vm4, %v743_v45, %v708_v18  ;;  %v397_v55 = vpack.c.bf16 %v744_v44, %v739_v38  ;;  %v515_v38 = vshrl.u32 %v514_v37, 7 }
 0x34e   :  { %v394_v58 = vpack.c.bf16 %v303_v54, %v287_v52  ;;  %v396_v59 = vpack.c.bf16 %v305_v53, %v289_v50  ;;  %v747_v60 = vpop.permute.xlu1 %746 }
 0x34f   :  { %v749_v61 = vunpack.i.h.bf16 %v747_v60  ;;  %v748_v62 = vunpack.i.l.bf16 %v747_v60  ;;  %471 = vmatprep.subr.bf16.mxu1 %v397_v55  ;;  %v516_v39 = vsub.s32 0, %v515_v38  ;;  %v520_v41 = vsub.s32 1, %v515_v38 }
 0x350   :  { %431 = vmatpush1.bf16.msra.mxu0 %v394_v58  ;;  %472 = vmatpush1.bf16.msra.mxu1 %v396_v59  ;;  %v524_v42 = vsub.s32 2, %v515_v38 }
 0x351   :  { %v321_v5 = vsel %vm318_vm9, %v714_v33, %v749_v61  ;;  %v401_v6 = vpack.c.bf16 %v754_v48, %v749_v61  ;;  %v319_v7 = vsel %vm318_vm9, %v748_v62, %v713_v34  ;;  %432 = vmatprep.subr.bf16.mxu0 %v399_v63  ;;  %v517_v44 = vrot.slane %v512_v40, %v516_v39 }
 0x352   :  { %v400_v8 = vpack.c.bf16 %v337_v0, %v321_v5  ;;  %v398_v9 = vpack.c.bf16 %v335_v1, %v319_v7  ;;  %v757_v10 = vpop.permute.xlu1 %756  ;;  %v521_v45 = vrot.slane %v512_v40, %v520_v41  ;;  %v525_v46 = vrot.slane %v512_v40, %v524_v42 }
 0x353   :  { %v759_v12 = vunpack.i.h.bf16 %v757_v10  ;;  %v758_v13 = vunpack.i.l.bf16 %v757_v10  ;;  %473 = vmatprep.subr.bf16.mxu1 %v401_v6 }
 0x354   :  { %433 = vmatpush1.bf16.msra.mxu0 %v398_v9  ;;  %474 = vmatpush1.bf16.msra.mxu1 %v400_v8 }
 0x355   :  { %v353_v17 = vsel %vm350_vm10, %v724_v43, %v759_v12  ;;  %v405_v18 = vpack.c.bf16 %v769_v2, %v759_v12  ;;  %v351_v19 = vsel %vm350_vm10, %v758_v13, %v723_v47  ;;  %434 = vmatprep.subr.bf16.mxu0 %v403_v14  ;;  %v528_v43 = vsub.s32 3, %v515_v38 }
 0x356   :  { %v404_v20 = vpack.c.bf16 %v369_v15, %v353_v17  ;;  %v402_v21 = vpack.c.bf16 %v367_v16, %v351_v19  ;;  %v762_v22 = vpop.permute.xlu1 %761 }
 0x357   :  { %v764_v23 = vunpack.i.h.bf16 %v762_v22  ;;  %v763_v24 = vunpack.i.l.bf16 %v762_v22  ;;  %475 = vmatprep.subr.bf16.mxu1 %v405_v18  ;;  %v529_v48 = vrot.slane %v512_v40, %v528_v43 }
 0x358   :  { %435 = vmatpush1.bf16.msra.mxu0 %v402_v21  ;;  %476 = vmatpush1.bf16.msra.mxu1 %v404_v20  ;;  %v510_v21 = vld [vmem:[%s1021_s5] sm:$0xff]  ;;  %s852_s5 = smov [#allocation5]  }
 0x359   :  { %v384_v26 = vsel %vm382_vm12, %v764_v23, %v379_v25  ;;  %v383_v27 = vsel %vm382_vm12, %v763_v24, %v764_v23  ;;  %v511_v24 = vld [vmem:[%s1022_s6] sm:$0xff]  ;;  %s648_s6 = sshll.u32 %s852_s5, 4  ;;  %s649_s6 = int_to_ptr.vmem [resolvable:$true] %s648_s6 }
 0x35a   :  { %v381_v28 = vpop.permute.xlu1 %380  ;;  %v407_v29 = vpack.c.bf16 %v384_v26, %v384_v26  ;;  %v406_v30 = vpack.c.bf16 %v383_v27, %v383_v27  ;;  %s813_s13 = scalar_lea.vmem %s649_s6, 512  ;;  %p818_p9 = scmp.lt.s32.totalorder %s649_s6, %s649_s6 }
 0x35b   :  { %v385_v31 = vsel %vm382_vm12, %v379_v25, %v381_v28  ;;  %v409_v32 = vpack.c.bf16 %v381_v28, %v381_v28  ;;  %p814_p8 = scmp.ne.s32.totalorder %s649_s6, %s813_s13  ;;  %p819_p10 = scmp.lt.s32.totalorder %s813_s13, %s813_s13 }
 0x35c   :  { %v408_v33 = vpack.c.bf16 %v385_v31, %v385_v31  ;;  %673 = vmatprep.subr.msk.bf16.mxu0 %vm415_vm13, %v407_v29  ;;  %v417_v34 = vsel %vm415_vm13, %v406_v30, 0 }
 0x35d   :  { %437 = vmatpush1.bf16.msra.mxu0 %v417_v34  ;;  %678 = vmatprep.subr.msk.bf16.mxu1 %vm415_vm13, %v409_v32  ;;  %p820_p11 = por %p819_p10, %p818_p9 }
 0x35e   :  { %v423_v36 = vsel %vm415_vm13, %v408_v33, 0 }
 0x35f   :  { %478 = vmatpush1.bf16.msra.mxu1 %v423_v36  ;;  %p821_p12 = pnand %p820_p11, %p814_p8 }
 0x360   :  { %674 = vmatmul.mubr.msk.bf16.vlgmr.msra.gmra.mrb[4].mxu0 %vm411_vm14, %v410_v35 }
 0x362   :  { %679 = vmatmul.mubr.msk.bf16.vlgmr.msra.gmra.mrb[4].mxu1 %vm411_vm14, %v410_v35 }
 0x433   :  { %v462_v47 = vpop.f32.mrb[4].mxu0 }
 0x434   :  { %v534_v49 = vmul.f32 %v517_v44, %v462_v47  ;;  %v464_v50 = vpop.f32.mrb[5].mxu0 }
 0x435   :  { %v535_v51 = vmul.f32 %v521_v45, %v464_v50  ;;  %v466_v52 = vpop.f32.mrb[6].mxu0  ;;  %v503_v53 = vpop.f32.mrb[4].mxu1 }
 0x436   :  { %v536_v54 = vmul.f32 %v525_v46, %v503_v53  ;;  %v467_v55 = vpop.f32.mrb[7].mxu0  ;;  %v505_v56 = vpop.f32.mrb[5].mxu1 }
 0x437   :  { %v537_v57 = vmul.f32 %v529_v48, %v505_v56  ;;  %v507_v58 = vpop.f32.mrb[6].mxu1  ;;  %v538_v59 = vadd.f32 %v535_v51, %v534_v49 }
 0x438   :  { %v508_v60 = vpop.f32.mrb[7].mxu1 }
 0x439   :  { %v539_v61 = vadd.f32 %v538_v59, %v536_v54  ;;  %v540_v62 = vsel %vm209_vm2, %v537_v57, 0.0 }
 0x43b   :  { %v541_v63 = vadd.f32 %v540_v62, %v539_v61 }
 0x43d   :  { %542 = vadd.xlane.f32.xlu0 %v541_v63 }
 0x4ca   :  { %v543_v0 = vpop.xlane.xlu0 %542 }
 0x4cb   :  { %v544_v1 = vmul.f32 0.0034722222, %v543_v0 }
 0x4cd   :  { %v545_v2 = vsub.f32 %v462_v47, %v544_v1  ;;  %v546_v3 = vsub.f32 %v464_v50, %v544_v1  ;;  %v547_v4 = vsub.f32 %v503_v53, %v544_v1  ;;  %v548_v5 = vsub.f32 %v505_v56, %v544_v1 }
 0x4cf   :  { %v549_v6 = vmul.f32 %v545_v2, %v517_v44  ;;  %v550_v7 = vmul.f32 %v546_v3, %v521_v45  ;;  %v551_v8 = vmul.f32 %v547_v4, %v525_v46  ;;  %v552_v9 = vmul.f32 %v548_v5, %v529_v48 }
 0x4d1   :  { %v553_v10 = vmul.f32 %v549_v6, %v549_v6  ;;  %v554_v11 = vmul.f32 %v550_v7, %v550_v7  ;;  %v556_v12 = vmul.f32 %v552_v9, %v552_v9  ;;  %v555_v13 = vmul.f32 %v551_v8, %v551_v8 }
 0x4d3   :  { %v557_v14 = vadd.f32 %v554_v11, %v553_v10  ;;  %v559_v16 = vsel %vm209_vm2, %v556_v12, 0.0 }
 0x4d5   :  { %v558_v15 = vadd.f32 %v557_v14, %v555_v13 }
 0x4d7   :  { %v560_v17 = vadd.f32 %v559_v16, %v558_v15 }
 0x4d9   :  { %561 = vadd.xlane.f32.xlu1 %v560_v17 }
 0x566   :  { %v562_v18 = vpop.xlane.xlu1 %561 }
 0x567   :  { %v563_v19 = vmul.f32 0.0034722222, %v562_v18 }
 0x569   :  { %v564_v20 = vadd.f32 1e-05, %v563_v19 }
 0x56b   :  { %789 = vrsqrt.f32 %v564_v20 }
 0x575   :  { %v790_v22 = vpop.eup %789 }
 0x576   :  { %v566_v23 = vmul.f32 %v790_v22, %v510_v21 }
 0x578   :  { %571 = vperm.xlu0 %770, %v566_v23   ;;  %v567_v25 = vmul.f32 %v566_v23, %v544_v1 }
 0x57a   :  { %v568_v26 = vsub.f32 %v511_v24, %v567_v25 }
 0x57c   :  { %580 = vperm.xlu1 %694, %v568_v26  }
 0x5f7   :  { %v572_v27 = vpop.permute.xlu0 %571 }
 0x5f8   :  { %v574_v28 = vmul.f32 %v572_v27, %v462_v47  ;;  %v575_v30 = vmul.f32 %v572_v27, %v464_v50  ;;  %v576_v34 = vmul.f32 %v572_v27, %v503_v53  ;;  %v577_v35 = vmul.f32 %v572_v27, %v505_v56 }
 0x5fb   :  { %v581_v29 = vpop.permute.xlu1 %580 }
 0x5fc   :  { %v583_v31 = vadd.f32 %v581_v29, %v574_v28  ;;  %v584_v33 = vadd.f32 %v581_v29, %v575_v30  ;;  %v585_v37 = vadd.f32 %v581_v29, %v576_v34  ;;  %v586_v38 = vadd.f32 %v581_v29, %v577_v35 }
 0x5fe   :  { %v587_v32 = vmax.f32 %v583_v31, 0.0  ;;  %v588_v36 = vmax.f32 %v584_v33, 0.0  ;;  %v589_v39 = vmax.f32 %v585_v37, 0.0  ;;  %v590_v40 = vmax.f32 %v586_v38, 0.0 }
 0x600   :  { %596 = vrot.lane.b32.xlu1 %v587_v32, %s844_s3  ;;  %v591_v41 = vsel %vm209_vm2, %v590_v40, 0.0 }
 0x604   :  { %598 = vrot.lane.b32.xlu1 %v588_v36, %s844_s3 }
 0x608   :  { %600 = vrot.lane.b32.xlu1 %v589_v39, %s844_s3 }
 0x60c   :  { %602 = vrot.lane.b32.xlu1 %v591_v41, %s844_s3 }
 0x672   :  { %v597_v42 = vpop.permute.xlu1 %596 }
 0x676   :  { %v599_v43 = vpop.permute.xlu1 %598 }
 0x677   :  { %v604_v44 = vsel %vm270_vm3, %v597_v42, %v599_v43 }
 0x678   :  { %v611_v45 = vmax.f32 %v587_v32, %v604_v44 }
 0x67a   :  { %619 = vrot.lane.b32.xlu1 %v611_v45, %s845_s23  ;;  %v601_v46 = vpop.permute.xlu1 %600 }
 0x67b   :  { %v605_v47 = vsel %vm270_vm3, %v599_v43, %v601_v46 }
 0x67c   :  { %v612_v48 = vmax.f32 %v588_v36, %v605_v47 }
 0x67e   :  { %621 = vrot.lane.b32.xlu0 %v612_v48, %s845_s23  ;;  %v603_v49 = vpop.permute.xlu1 %602 }
 0x67f   :  { %v606_v50 = vsel %vm270_vm3, %v601_v46, %v603_v49  ;;  %v614_v51 = vmax.f32 %v591_v41, %v603_v49 }
 0x680   :  { %v613_v52 = vmax.f32 %v589_v39, %v606_v50 }
 0x682   :  { %625 = vrot.lane.b32.xlu0 %v614_v51, %s845_s23  ;;  %623 = vrot.lane.b32.xlu1 %v613_v52, %s845_s23 }
 0x6ec   :  { %v620_v53 = vpop.permute.xlu1 %619 }
 0x6f0   :  { %v622_v54 = vpop.permute.xlu0 %621 }
 0x6f1   :  { %v627_v55 = vsel %vm302_vm4, %v620_v53, %v622_v54 }
 0x6f2   :  { %v634_v56 = vmax.f32 %v611_v45, %v627_v55 }
 0x6f4   :  { %638 = vst [vmem:[#allocation5] sm:$0xff] %v634_v56  ;;  %v626_v57 = vpop.permute.xlu0 %625  ;;  %v624_v58 = vpop.permute.xlu1 %623 }
 0x6f5   :  { %v637_v59 = vmax.f32 %v614_v51, %v626_v57  ;;  %v628_v60 = vsel %vm302_vm4, %v622_v54, %v624_v58  ;;  %v629_v61 = vsel %vm302_vm4, %v624_v58, %v626_v57 }
 0x6f6   :  { %v635_v62 = vmax.f32 %v612_v48, %v628_v60  ;;  %v636_v63 = vmax.f32 %v613_v52, %v629_v61 }
 0x6f7   :  { %641 = vst.msk [vmem:[#allocation5 + $0x18] sm:$0xff] %vm209_vm2, %v637_v59 }
 0x6f8   :  { %639 = vst [vmem:[#allocation5 + $0x8] sm:$0xff] %v635_v62  ;;  %640 = vst [vmem:[#allocation5 + $0x10] sm:$0xff] %v636_v63 }
 0x6f9   :  { %824 = shalt.err (!%p821_p12)
}
 0x6fa   :  { %s825_s16 = scalar_lea.hbm %s1024_s8, 512 }
 0x6fb   :  { %p826_p13 = scmp.ne.s32.totalorder %s1024_s8, %s825_s16  ;;  %p829_p0 = scmp.lt.u32.totalorder %s825_s16, %s1024_s8 }
 0x6fd   :  { %p831_p1 = pnand %p829_p0, %p826_p13 }
 0x6ff   :  { %834 = shalt.err (!%p831_p1)
}
 0x700   :  { %651 = dma.vmem_to_hbm [thread:$0]  %s649_s6, 512, %s1024_s8, [#allocation4]  }
 0x701   :  { %837 = dma.done.wait [#allocation4], 512  }
 0x702   :  { %838 = vsyncadd [#allocation4], 4294966784 }
 0x703   :  { %655 = vsyncpa [#allocation3], 1 }
 0x704   :  { %656 = vsyncpa [#allocation4], 1 }

</bundles_post_ra>
